<compile_context>
chip_gen: v7x
topology: tpu7x:2x2x1
jax: 0.10.0
libtpu: 0.0.40
codegen_flags: <defaults>
</compile_context>

<pallas_src>
import math

import jax
import jax.numpy as jnp
from jax.experimental import pallas as pl
from jax.experimental.pallas import tpu as pltpu

_LANE = 128
_SUB = 8
_BLOCK_ROWS = 2048   # (2048, 128) f32 tile = 1 MiB; multiple of 16 keeps bf16 packing clean
_NSPLIT = 2          # leading "parallel" axis -> 2-way TC split on v7x, harmless on 1-TC chips


def _round_up(x, m):
    return ((x + m - 1) // m) * m


def _sqdiff_sum_kernel(l_ref, t_ref, out_ref, acc_ref):
    """Accumulate sum((l - t)^2) for one split into an (8, 128) VMEM accumulator."""
    i = pl.program_id(1)

    @pl.when(i == 0)
    def _init():
        acc_ref[...] = jnp.zeros_like(acc_ref)

    d = l_ref[...].astype(jnp.float32) - t_ref[...].astype(jnp.float32)
    sq = d * d
    # Reduce only along the leading (sublane-block) axis: plain VPU vector adds.
    # The (rows, 128) -> (rows/8, 8, 128) reshape matches the native vreg tiling,
    # so the hot loop stays off the XLU / SMEM paths (cross-lane reduce happens
    # exactly once, in the tiny JAX epilogue).
    acc_ref[...] += jnp.sum(sq.reshape(-1, _SUB, _LANE), axis=0)

    @pl.when(i == pl.num_programs(1) - 1)
    def _finalize():
        out_ref[0] = acc_ref[...]


@jax.jit
def mse_loss(logits, target):
    """Pallas-backed MSELoss.forward: mean((logits - target)^2) / 26 * 1000."""
    assert logits.shape == target.shape
    n = math.prod(logits.shape)

    lflat = logits.reshape(-1)   # native dtype: no wrapper-side cast (no extra HBM pass)
    tflat = target.reshape(-1)

    rows = pl.cdiv(n, _LANE)
    block_rows = min(_BLOCK_ROWS, _round_up(rows, 16))
    nblocks = pl.cdiv(rows, block_rows)
    nsplit = _NSPLIT if nblocks >= _NSPLIT else 1
    blocks_per_split = pl.cdiv(nblocks, nsplit)
    rows_padded = nsplit * blocks_per_split * block_rows
    n_padded = rows_padded * _LANE

    if n_padded != n:
        # Only taken when n is not tile-aligned. Zero padding contributes
        # (0 - 0)^2 == 0 to the sum; we divide by the true n below.
        lflat = jnp.pad(lflat, (0, n_padded - n))
        tflat = jnp.pad(tflat, (0, n_padded - n))

    l2 = lflat.reshape(rows_padded, _LANE)
    t2 = tflat.reshape(rows_padded, _LANE)

    in_spec = pl.BlockSpec(
        (block_rows, _LANE),
        lambda c, i: (c * blocks_per_split + i, 0),
    )

    partials = pl.pallas_call(
        _sqdiff_sum_kernel,
        out_shape=jax.ShapeDtypeStruct((nsplit, _SUB, _LANE), jnp.float32),
        grid_spec=pltpu.PrefetchScalarGridSpec(
            num_scalar_prefetch=0,
            grid=(nsplit, blocks_per_split),
            in_specs=[in_spec, in_spec],
            out_specs=pl.BlockSpec((1, _SUB, _LANE), lambda c, i: (c, 0, 0)),
            scratch_shapes=[pltpu.VMEM((_SUB, _LANE), jnp.float32)],
        ),
        compiler_params=pltpu.CompilerParams(
            dimension_semantics=("parallel", "arbitrary"),
        ),
    )(l2, t2)

    sq_sum = jnp.sum(partials)               # tiny (nsplit, 8, 128) final reduce
    mse = sq_sum / jnp.float32(n)            # divide by the TRUE element count
    return mse / 26.0 * 1000.0


def _mse_loss_ref(logits, target):
    d = logits.astype(jnp.float32) - target.astype(jnp.float32)
    return jnp.mean(d * d) / 26.0 * 1000.0


if __name__ == "__main__":
    key = jax.random.PRNGKey(0)
    k1, k2 = jax.random.split(key)
    logits = jax.random.normal(k1, (2, 4, 16, 16), jnp.float32)
    target = jax.random.normal(k2, (2, 4, 16, 16), jnp.float32)

    loss = mse_loss(logits, target)
    jax.block_until_ready(loss)

    loss_ref = _mse_loss_ref(logits, target)
    assert jnp.allclose(loss, loss_ref, rtol=1e-5, atol=1e-4), (loss, loss_ref)

    print("KERNEL_OK")
</pallas_src>

<mosaic_0001>
module attributes {stable_mosaic.version = 11 : i64} {
  func.func @_sqdiff_sum_kernel(%arg0: i32, %arg1: i32, %arg2: memref<16x128xf32, #tpu.memory_space<vmem>>, %arg3: memref<16x128xf32, #tpu.memory_space<vmem>>, %arg4: memref<1x8x128xf32, #tpu.memory_space<vmem>>, %arg5: memref<8x128xf32, #tpu.memory_space<vmem>>) attributes {dimension_semantics = [#tpu.dimension_semantics<parallel>, #tpu.dimension_semantics<arbitrary>], iteration_bounds = array<i64: 1, 1>, scalar_prefetch = 0 : i64, scratch_operands = 1 : i64, tpu.core_type = #tpu.core_type<tc>, window_params = [{transform_indices = @transform_0, window_bounds = array<i64: 16, 128>}, {transform_indices = @transform_1, window_bounds = array<i64: 16, 128>}, {transform_indices = @transform_2, window_bounds = array<i64: 1, 8, 128>}]} {
    %c0_i32 = arith.constant 0 : i32
    %0 = arith.cmpi eq, %arg1, %c0_i32 : i32
    %1 = arith.extui %0 : i1 to i32
    %c0_i32_0 = arith.constant 0 : i32
    %2 = arith.cmpi ne, %1, %c0_i32_0 : i32
    scf.if %2 {
      %cst_10 = arith.constant 0.000000e+00 : f32
      %15 = vector.broadcast %cst_10 : f32 to vector<8x128xf32>
      %c0_11 = arith.constant 0 : index
      %c0_12 = arith.constant 0 : index
      %16 = vector.load %arg5[%c0_11, %c0_12] : memref<8x128xf32, #tpu.memory_space<vmem>>, vector<8x128xf32>
      tpu.vector_store %arg5[%c0_11, %c0_12], %15 {strides = array<i32>} : memref<8x128xf32, #tpu.memory_space<vmem>>, vector<8x128xf32>,
    } else {
    }
    %c0 = arith.constant 0 : index
    %c0_1 = arith.constant 0 : index
    %3 = vector.load %arg2[%c0, %c0_1] : memref<16x128xf32, #tpu.memory_space<vmem>>, vector<16x128xf32>
    %c0_2 = arith.constant 0 : index
    %c0_3 = arith.constant 0 : index
    %4 = vector.load %arg3[%c0_2, %c0_3] : memref<16x128xf32, #tpu.memory_space<vmem>>, vector<16x128xf32>
    %5 = arith.subf %3, %4 : vector<16x128xf32>
    %6 = arith.mulf %5, %5 : vector<16x128xf32>
    %c0_4 = arith.constant 0 : index
    %c0_5 = arith.constant 0 : index
    %7 = vector.load %arg5[%c0_4, %c0_5] : memref<8x128xf32, #tpu.memory_space<vmem>>, vector<8x128xf32>
    %8 = vector.shape_cast %6 : vector<16x128xf32> to vector<2x8x128xf32>
    %cst = arith.constant dense<0.000000e+00> : vector<8x128xf32>
    %9 = vector.multi_reduction <add>, %8, %cst [0] : vector<2x8x128xf32> to vector<8x128xf32>
    %10 = arith.addf %7, %9 : vector<8x128xf32>
    %c0_6 = arith.constant 0 : index
    %c0_7 = arith.constant 0 : index
    %11 = vector.load %arg5[%c0_6, %c0_7] : memref<8x128xf32, #tpu.memory_space<vmem>>, vector<8x128xf32>
    tpu.vector_store %arg5[%c0_6, %c0_7], %10 {strides = array<i32>} : memref<8x128xf32, #tpu.memory_space<vmem>>, vector<8x128xf32>,
    %c0_i32_8 = arith.constant 0 : i32
    %12 = arith.cmpi eq, %arg1, %c0_i32_8 : i32
    %13 = arith.extui %12 : i1 to i32
    %c0_i32_9 = arith.constant 0 : i32
    %14 = arith.cmpi ne, %13, %c0_i32_9 : i32
    scf.if %14 {
      %c0_10 = arith.constant 0 : index
      %c0_11 = arith.constant 0 : index
      %15 = vector.load %arg5[%c0_10, %c0_11] : memref<8x128xf32, #tpu.memory_space<vmem>>, vector<8x128xf32>
      %c0_12 = arith.constant 0 : index
      %c0_13 = arith.constant 0 : index
      %c0_14 = arith.constant 0 : index
      %16 = vector.load %arg4[%c0_12, %c0_13, %c0_14] : memref<1x8x128xf32, #tpu.memory_space<vmem>>, vector<1x8x128xf32>
      %17 = vector.shape_cast %16 : vector<1x8x128xf32> to vector<8x128xf32>
      %18 = vector.shape_cast %15 : vector<8x128xf32> to vector<1x8x128xf32>
      tpu.vector_store %arg4[%c0_12, %c0_13, %c0_14], %18 {strides = array<i32>} : memref<1x8x128xf32, #tpu.memory_space<vmem>>, vector<1x8x128xf32>,
    } else {
    }
    return
  }
  func.func @transform_0(%arg0: i32, %arg1: i32) -> (i32, i32) {
    %c1_i32 = arith.constant 1 : i32
    %0 = arith.muli %arg0, %c1_i32 : i32
    %1 = arith.addi %0, %arg1 : i32
    %c0_i32 = arith.constant 0 : i32
    %c0_i32_0 = arith.constant 0 : i32
    return %1, %c0_i32 : i32, i32
  }
  func.func @transform_1(%arg0: i32, %arg1: i32) -> (i32, i32) {
    %c1_i32 = arith.constant 1 : i32
    %0 = arith.muli %arg0, %c1_i32 : i32
    %1 = arith.addi %0, %arg1 : i32
    %c0_i32 = arith.constant 0 : i32
    %c0_i32_0 = arith.constant 0 : i32
    return %1, %c0_i32 : i32, i32
  }
  func.func @transform_2(%arg0: i32, %arg1: i32) -> (i32, i32, i32) {
    %c0_i32 = arith.constant 0 : i32
    %c0_i32_0 = arith.constant 0 : i32
    %c0_i32_1 = arith.constant 0 : i32
    return %arg0, %c0_i32, %c0_i32_0 : i32, i32, i32
  }
}

</mosaic_0001>

<bundles_post_ra>
// kernel: mse_loss.1
= control target key start
LH: loop header
LB: loop body
LE: loop exit
PB: predicated region body
PF: predicated region fallthrough
CT: control target
= control target key end

     0   :  { %s123_s0 = inlined_call_operand.vmem [shape: f32[16,128], index: 0, kind: input, shape index: {}]   ;;  %s124_s1 = inlined_call_operand.vmem [shape: f32[16,128], index: 1, kind: input, shape index: {}]   ;;  %s125_s2 = inlined_call_operand.vmem [shape: f32[1,8,128], index: 2, kind: output, shape index: {}]  }
   0x1   :  { %v60_v0 = vld [vmem:[%s123_s0] sm:$0xff]  ;;  %v61_v1 = vld [vmem:[%s123_s0 + $0x8] sm:$0xff] }
   0x2   :  { %v62_v2 = vld [vmem:[%s124_s1] sm:$0xff]  ;;  %v63_v3 = vld [vmem:[%s124_s1 + $0x8] sm:$0xff] }
   0x3   :  { %v64_v4 = vsub.f32 %v60_v0, %v62_v2  ;;  %v65_v5 = vsub.f32 %v61_v1, %v63_v3 }
   0x5   :  { %v66_v6 = vmul.f32 %v64_v4, %v64_v4  ;;  %v67_v7 = vmul.f32 %v65_v5, %v65_v5 }
   0x7   :  { %v69_v8 = vadd.f32 %v67_v7, %v66_v6 }
   0x9   :  { %76 = vst [vmem:[%s125_s2] sm:$0xff] %v69_v8 }

</bundles_post_ra>
